<compile_context>
chip_gen: v7x
topology: tpu7x:2x2x1
jax: 0.10.0
libtpu: 0.0.40
codegen_flags: <defaults>
</compile_context>

<pallas_src>
import jax
import jax.numpy as jnp
from jax.experimental import pallas as pl
from jax.experimental.pallas import tpu as pltpu


def _sigmoid_kernel(x_ref, o_ref):
    x = x_ref[...]
    # sigmoid(x) = 1 / (1 + exp(-x)); exp -> EUP, add/div -> VPU. Exact
    # reciprocal keeps the 1e-6 tolerance; f32 exp overflow for very negative
    # x gives inf -> result 0 (no NaN).
    o_ref[...] = (1.0 / (1.0 + jnp.exp(-x))).astype(o_ref.dtype)


def sigmoid_pallas(x_nchw: jax.Array) -> jax.Array:
    n, c, h, w = x_nchw.shape
    total = n * c * h * w
    assert total % 128 == 0, "expected element count to be a multiple of 128"

    # Flat, lane-dense 2-D slab: last dim exactly 128 lanes, rest on sublanes.
    rows = total // 128
    x2d = x_nchw.reshape(rows, 128)

    elem_bytes = jnp.dtype(x2d.dtype).itemsize
    out2d = pl.pallas_call(
        _sigmoid_kernel,
        out_shape=jax.ShapeDtypeStruct((rows, 128), x2d.dtype),
        in_specs=[pl.BlockSpec(memory_space=pltpu.MemorySpace.VMEM)],
        out_specs=pl.BlockSpec(memory_space=pltpu.MemorySpace.VMEM),
        # Donate the input buffer to the output (same shape/dtype).
        input_output_aliases={0: 0},
        # Advertise the (tiny) true cost so XLA can schedule around the call.
        cost_estimate=pl.CostEstimate(
            flops=5 * total,
            transcendentals=total,
            bytes_accessed=2 * total * elem_bytes,
        ),
    )(x2d)

    # Back to the original NCHW shape (pure relabel since H = W = 1).
    return out2d.reshape(n, c, h, w)


if __name__ == "__main__":
    key = jax.random.PRNGKey(0)
    # Shape implied by the module's forward: [1, 2304, 1, 1]
    x661 = jax.random.normal(key, (1, 2304, 1, 1), dtype=jnp.float32)

    y = sigmoid_pallas(x661)
    jax.block_until_ready(y)

    # Sanity check against plain JAX reference
    ref = jax.nn.sigmoid(x661)
    assert y.shape == (1, 2304, 1, 1)
    assert jnp.allclose(y, ref, atol=1e-6, rtol=1e-6)

    print("KERNEL_OK")
</pallas_src>

<mosaic_0001>
module attributes {stable_mosaic.version = 11 : i64} {
  func.func @_sigmoid_kernel(%arg0: memref<18x128xf32, #tpu.memory_space<vmem>>, %arg1: memref<18x128xf32, #tpu.memory_space<vmem>>) attributes {dimension_semantics = [], scalar_prefetch = 0 : i64, scratch_operands = 0 : i64, tpu.core_type = #tpu.core_type<tc>} {
    %c0 = arith.constant 0 : index
    %c0_0 = arith.constant 0 : index
    %0 = vector.load %arg0[%c0, %c0_0] : memref<18x128xf32, #tpu.memory_space<vmem>>, vector<18x128xf32>
    %cst = arith.constant 0.000000e+00 : f32
    %1 = vector.broadcast %cst : f32 to vector<18x128xf32>
    %2 = arith.subf %1, %0 : vector<18x128xf32>
    %3 = math.exp %2 : vector<18x128xf32>
    %cst_1 = arith.constant 1.000000e+00 : f32
    %4 = vector.broadcast %cst_1 : f32 to vector<18x128xf32>
    %5 = arith.addf %4, %3 : vector<18x128xf32>
    %cst_2 = arith.constant 1.000000e+00 : f32
    %6 = vector.broadcast %cst_2 : f32 to vector<18x128xf32>
    %7 = arith.divf %6, %5 : vector<18x128xf32>
    %c0_3 = arith.constant 0 : index
    %c0_4 = arith.constant 0 : index
    %8 = vector.load %arg1[%c0_3, %c0_4] : memref<18x128xf32, #tpu.memory_space<vmem>>, vector<18x128xf32>
    tpu.vector_store %arg1[%c0_3, %c0_4], %7 {strides = array<i32>} : memref<18x128xf32, #tpu.memory_space<vmem>>, vector<18x128xf32>,
    return
  }
}

</mosaic_0001>

<bundles_post_ra>
// kernel: tpu_custom_call.1
= control target key start
LH: loop header
LB: loop body
LE: loop exit
PB: predicated region body
PF: predicated region fallthrough
CT: control target
= control target key end

     0   :  { %6 = vsyncpa [#allocation3], 0  ;;  %s172_s0 = inlined_call_operand.hbm [shape: f32[18,128], index: 0, kind: input, shape index: {}, may-alias: {0,1}]   ;;  %s173_s1 = inlined_call_operand.hbm [shape: f32[18,128], index: 1, kind: output, shape index: {}, may-alias: {0,1}]  }
   0x1   :  { %7 = vsyncpa [#allocation4], 0  ;;  %s128_s6 = smov [#allocation2]   ;;  %s80_s10 = scalar_lea.hbm %s172_s0, 384 }
   0x2   :  { %s13_s7 = sshll.u32 %s128_s6, 4  ;;  %p81_p0 = scmp.ne.s32.totalorder %s172_s0, %s80_s10  ;;  %s14_s7 = int_to_ptr.vmem [resolvable:$true] %s13_s7 }
   0x3   :  { %p84_p1 = scmp.lt.u32.totalorder %s80_s10, %s172_s0 }
   0x5   :  { %p86_p2 = pnand %p84_p1, %p81_p0 }
   0x7   :  { %89 = shalt.err (!%p86_p2)
}
   0x8   :  { %s90_s15 = scalar_lea.vmem %s14_s7, 384  ;;  %p95_p4 = scmp.lt.s32.totalorder %s14_s7, %s14_s7 }
   0x9   :  { %p91_p3 = scmp.ne.s32.totalorder %s14_s7, %s90_s15  ;;  %p96_p5 = scmp.lt.s32.totalorder %s90_s15, %s90_s15 }
   0xb   :  { %p97_p6 = por %p96_p5, %p95_p4 }
   0xd   :  { %p98_p7 = pnand %p97_p6, %p91_p3 }
   0xf   :  { %101 = shalt.err (!%p98_p7)
}
  0x10   :  { %s129_s16 = smov 128   ;;  %s130_s17 = smov 8  }
  0x11   :  { %19 = dma.hbm_to_vmem [thread:$0]  %s172_s0, 384, %s14_s7, [#allocation3], %s129_s16, %s129_s16, %s130_s17  }
  0x12   :  { %124 = dma.done.wait [#allocation3], 384  }
  0x13   :  { %125 = vsyncadd [#allocation3], 4294966912  ;;  %v23_v0 = vld [vmem:[#allocation2] sm:$0xff]  ;;  %v24_v1 = vld [vmem:[#allocation2 + $0x8] sm:$0xff]  ;;  %s131_s0 = smov [#allocation5]  }
  0x14   :  { %v25_v2 = vld [vmem:[#allocation2 + $0x10] sm:$0x3]  ;;  %v26_v3 = vsub.f32 0.0, %v23_v0  ;;  %v27_v4 = vsub.f32 0.0, %v24_v1  ;;  %s52_s20 = sshll.u32 %s131_s0, 4  ;;  %s53_s20 = int_to_ptr.vmem [resolvable:$true] %s52_s20 }
  0x15   :  { %v28_v5 = vsub.f32 0.0, %v25_v2  ;;  %s102_s21 = scalar_lea.vmem %s53_s20, 384  ;;  %p107_p9 = scmp.lt.s32.totalorder %s53_s20, %s53_s20 }
  0x16   :  { %v29_v6 = vmul.f32 1.442695, %v26_v3  ;;  %v31_v7 = vmul.f32 1.442695, %v27_v4  ;;  %p103_p8 = scmp.ne.s32.totalorder %s53_s20, %s102_s21  ;;  %p108_p10 = scmp.lt.s32.totalorder %s102_s21, %s102_s21 }
  0x17   :  { %v33_v8 = vmul.f32 1.442695, %v28_v5 }
  0x18   :  { %68 = vpow2.f32 %v29_v6  ;;  %p109_p11 = por %p108_p10, %p107_p9 }
  0x19   :  { %70 = vpow2.f32 %v31_v7 }
  0x1a   :  { %72 = vpow2.f32 %v33_v8  ;;  %p110_p12 = pnand %p109_p11, %p103_p8 }
  0x22   :  { %v69_v9 = vpop.eup %68 }
  0x23   :  { %v71_v10 = vpop.eup %70  ;;  %v35_v11 = vadd.f32 1.0, %v69_v9 }
  0x24   :  { %v73_v12 = vpop.eup %72  ;;  %v36_v13 = vadd.f32 1.0, %v71_v10 }
  0x25   :  { %74 = vrcp.f32 %v35_v11  ;;  %v37_v14 = vadd.f32 1.0, %v73_v12 }
  0x26   :  { %76 = vrcp.f32 %v36_v13 }
  0x27   :  { %78 = vrcp.f32 %v37_v14 }
  0x2f   :  { %v75_v15 = vpop.eup %74 }
  0x30   :  { %v77_v16 = vpop.eup %76  ;;  %44 = vst [vmem:[#allocation5] sm:$0xff] %v75_v15 }
  0x31   :  { %v79_v17 = vpop.eup %78  ;;  %45 = vst [vmem:[#allocation5 + $0x8] sm:$0xff] %v77_v16 }
  0x32   :  { %46 = vst [vmem:[#allocation5 + $0x10] sm:$0x3] %v79_v17 }
  0x33   :  { %113 = shalt.err (!%p110_p12)
}
  0x34   :  { %s114_s24 = scalar_lea.hbm %s173_s1, 384 }
  0x35   :  { %p115_p13 = scmp.ne.s32.totalorder %s173_s1, %s114_s24  ;;  %p118_p0 = scmp.lt.u32.totalorder %s114_s24, %s173_s1 }
  0x37   :  { %p120_p1 = pnand %p118_p0, %p115_p13 }
  0x39   :  { %123 = shalt.err (!%p120_p1)
}
  0x3a   :  { %58 = dma.vmem_to_hbm [thread:$0]  %s53_s20, 384, %s173_s1, [#allocation4], %s129_s16, %s129_s16, %s130_s17  }
  0x3b   :  { %126 = dma.done.wait [#allocation4], 384  }
  0x3c   :  { %127 = vsyncadd [#allocation4], 4294966912 }
  0x3d   :  { %62 = vsyncpa [#allocation3], 1 }
  0x3e   :  { %63 = vsyncpa [#allocation4], 1 }

</bundles_post_ra>
